<compile_context>
chip_gen: v7x
topology: tpu7x:2x2x1
jax: 0.10.0
libtpu: 0.0.40
codegen_flags: <defaults>
</compile_context>

<pallas_src>
import jax
import jax.numpy as jnp
from jax.experimental import pallas as pl
from jax.experimental.pallas import tpu as pltpu

_SQRT_HALF = 0.7071067811865476


def _erf_approx(x):
    # Abramowitz & Stegun 7.1.26 (max abs error ~1.5e-7): VPU FMAs + one EUP exp.
    a1, a2, a3, a4, a5 = 0.254829592, -0.284496736, 1.421413741, -1.453152027, 1.061405429
    p = 0.3275911
    ax = jnp.abs(x)
    t = 1.0 / (1.0 + p * ax)
    poly = ((((a5 * t + a4) * t + a3) * t + a2) * t + a1) * t
    e = 1.0 - poly * jnp.exp(-ax * ax)
    return jnp.where(x < 0, -e, e)


def _gelu_exact(x):
    # Exact GELU: 0.5 * x * (1 + erf(x / sqrt(2)))  (torch nn.GELU default).
    return 0.5 * x * (1.0 + _erf_approx(x * _SQRT_HALF))


def _mlp_kernel(x_ref, w1_ref, b1_ref, w2_ref, b2_ref, o_ref):
    # x_ref : (tm, Cin) row tile      w1_ref: (Cin, H)   b1_ref: (1, H)
    # w2_ref: (H, Cout)               b2_ref: (1, Cout)  o_ref : (tm, Cout)
    x = x_ref[...]
    # fc1 + bias, accumulate in f32 on the MXU.
    h = jnp.dot(x, w1_ref[...], preferred_element_type=jnp.float32)
    h = h + b1_ref[...].astype(jnp.float32)
    # exact GELU in f32 (EUP exp + VPU); dropout(p=0) is identity.
    a = _gelu_exact(h)
    # fc2 + bias; feed the MXU in the weight dtype (bf16-native path if bf16).
    a = a.astype(w2_ref.dtype)
    y = jnp.dot(a, w2_ref[...], preferred_element_type=jnp.float32)
    y = y + b2_ref[...].astype(jnp.float32)
    o_ref[...] = y.astype(o_ref.dtype)


def mlp_forward(x, w1, b1, w2, b2, *, block_rows=None):
    """Mlp forward. x: (..., Cin); w1: (Cin, H); b1: (H,); w2: (H, Cout); b2: (Cout,).

    Weights are in (in, out) layout, i.e. the transpose of torch nn.Linear.weight.
    """
    lead = x.shape[:-1]
    Cin = x.shape[-1]
    H = w1.shape[1]
    Cout = w2.shape[1]
    assert w1.shape == (Cin, H)
    assert b1.shape == (H,)
    assert w2.shape == (H, Cout)
    assert b2.shape == (Cout,)

    M = 1
    for d in lead:
        M *= int(d)
    xm = x.reshape(M, Cin)

    itemsize = jnp.dtype(x.dtype).itemsize
    if block_rows is None:
        if M <= 1024:
            # Single fused invocation: grid of 1, no per-step overhead.
            block_rows = M
        else:
            # Budget the row tile so double-buffered (tm, Cin)/(tm, Cout) slabs
            # plus the f32 hidden intermediate fit comfortably next to the
            # resident weights inside v7x's scoped VMEM.
            per_row_bytes = 4 * (Cin + H + Cout) + 2 * itemsize * (Cin + Cout)
            budget = 12 * 1024 * 1024
            rows = budget // max(per_row_bytes, 1)
            rows = max(128, min(1024, rows))
            block_rows = max(8, (rows // 8) * 8)
    tm = max(1, min(block_rows, M))

    Mp = ((M + tm - 1) // tm) * tm
    if Mp != M:
        xm = jnp.pad(xm, ((0, Mp - M), (0, 0)))
    grid = (Mp // tm,)

    # Biases as (1, features): lane axis = feature axis (lane-dense when >=128).
    b1_2d = b1.reshape(1, H)
    b2_2d = b2.reshape(1, Cout)

    out = pl.pallas_call(
        _mlp_kernel,
        out_shape=jax.ShapeDtypeStruct((Mp, Cout), x.dtype),
        grid_spec=pltpu.PrefetchScalarGridSpec(
            num_scalar_prefetch=0,
            grid=grid,
            in_specs=[
                pl.BlockSpec((tm, Cin), lambda i: (i, 0)),
                pl.BlockSpec((Cin, H), lambda i: (0, 0)),   # resident weight
                pl.BlockSpec((1, H), lambda i: (0, 0)),     # resident bias
                pl.BlockSpec((H, Cout), lambda i: (0, 0)),  # resident weight
                pl.BlockSpec((1, Cout), lambda i: (0, 0)),  # resident bias
            ],
            out_specs=pl.BlockSpec((tm, Cout), lambda i: (i, 0)),
        ),
        compiler_params=pltpu.CompilerParams(
            # Row axis is embarrassingly parallel -> shards across v7x's 2 TCs;
            # measured no-op on single-TC v5e/v6e.
            dimension_semantics=("parallel",)),
    )(xm, w1, b1_2d, w2, b2_2d)

    if Mp != M:
        out = out[:M]
    return out.reshape(*lead, Cout)


def _reference(x, w1, b1, w2, b2):
    # Pure-JAX transcription of the PyTorch forward (drop=0.0 => identity).
    h = jnp.dot(x, w1) + b1
    a = jax.nn.gelu(h, approximate=False)  # exact erf GELU = nn.GELU() default
    return jnp.dot(a, w2) + b2


if __name__ == "__main__":
    key = jax.random.PRNGKey(0)
    kx, kw1, kb1, kw2, kb2 = jax.random.split(key, 5)

    B, N = 2, 8                      # batch, tokens
    in_features = 16
    hidden_features = 32
    out_features = in_features       # Mlp default: out_features = in_features

    x = jax.random.normal(kx, (B, N, in_features), dtype=jnp.float32)
    w1 = 0.1 * jax.random.normal(kw1, (in_features, hidden_features), dtype=jnp.float32)
    b1 = 0.1 * jax.random.normal(kb1, (hidden_features,), dtype=jnp.float32)
    w2 = 0.1 * jax.random.normal(kw2, (hidden_features, out_features), dtype=jnp.float32)
    b2 = 0.1 * jax.random.normal(kb2, (out_features,), dtype=jnp.float32)

    out = mlp_forward(x, w1, b1, w2, b2)
    out = jax.block_until_ready(out)

    ref = _reference(x, w1, b1, w2, b2)
    assert out.shape == (B, N, out_features)
    assert jnp.allclose(out, ref, atol=1e-4, rtol=1e-4), float(jnp.max(jnp.abs(out - ref)))
    print("KERNEL_OK")
</pallas_src>

<mosaic_0001>
module attributes {stable_mosaic.version = 11 : i64} {
  func.func @_mlp_kernel(%arg0: i32, %arg1: memref<16x16xf32, #tpu.memory_space<vmem>>, %arg2: memref<16x32xf32, #tpu.memory_space<vmem>>, %arg3: memref<1x32xf32, #tpu.memory_space<vmem>>, %arg4: memref<32x16xf32, #tpu.memory_space<vmem>>, %arg5: memref<1x16xf32, #tpu.memory_space<vmem>>, %arg6: memref<16x16xf32, #tpu.memory_space<vmem>>) attributes {dimension_semantics = [#tpu.dimension_semantics<parallel>], iteration_bounds = array<i64: 1>, scalar_prefetch = 0 : i64, scratch_operands = 0 : i64, tpu.core_type = #tpu.core_type<tc>, window_params = [{transform_indices = @transform_0, window_bounds = array<i64: 16, 16>}, {pipeline_mode = #tpu.pipeline_mode<synchronous>, transform_indices = @transform_1, window_bounds = array<i64: 16, 32>}, {pipeline_mode = #tpu.pipeline_mode<synchronous>, transform_indices = @transform_2, window_bounds = array<i64: 1, 32>}, {pipeline_mode = #tpu.pipeline_mode<synchronous>, transform_indices = @transform_3, window_bounds = array<i64: 32, 16>}, {pipeline_mode = #tpu.pipeline_mode<synchronous>, transform_indices = @transform_4, window_bounds = array<i64: 1, 16>}, {transform_indices = @transform_5, window_bounds = array<i64: 16, 16>}]} {
    %c0 = arith.constant 0 : index
    %c0_0 = arith.constant 0 : index
    %0 = vector.load %arg1[%c0, %c0_0] : memref<16x16xf32, #tpu.memory_space<vmem>>, vector<16x16xf32>
    %c0_1 = arith.constant 0 : index
    %c0_2 = arith.constant 0 : index
    %1 = vector.load %arg2[%c0_1, %c0_2] : memref<16x32xf32, #tpu.memory_space<vmem>>, vector<16x32xf32>
    %cst = arith.constant dense<0.000000e+00> : vector<16x32xf32>
    %2 = tpu.matmul %0, %1, %cst {dimension_numbers = #tpu.dot_dimension_numbers<[1], [0], [0], [1], [0, 0, 1, 1], [], []>} : vector<16x16xf32>, vector<16x32xf32>, vector<16x32xf32> -> vector<16x32xf32>
    %c0_3 = arith.constant 0 : index
    %c0_4 = arith.constant 0 : index
    %3 = vector.load %arg3[%c0_3, %c0_4] : memref<1x32xf32, #tpu.memory_space<vmem>>, vector<1x32xf32>
    %4 = vector.broadcast %3 : vector<1x32xf32> to vector<16x32xf32>
    %5 = arith.addf %2, %4 : vector<16x32xf32>
    %cst_5 = arith.constant 5.000000e-01 : f32
    %6 = vector.broadcast %cst_5 : f32 to vector<16x32xf32>
    %7 = arith.mulf %6, %5 : vector<16x32xf32>
    %cst_6 = arith.constant 0.707106769 : f32
    %8 = vector.broadcast %cst_6 : f32 to vector<16x32xf32>
    %9 = arith.mulf %5, %8 : vector<16x32xf32>
    %10 = math.absf %9 : vector<16x32xf32>
    %cst_7 = arith.constant 0.327591091 : f32
    %11 = vector.broadcast %cst_7 : f32 to vector<16x32xf32>
    %12 = arith.mulf %11, %10 : vector<16x32xf32>
    %cst_8 = arith.constant 1.000000e+00 : f32
    %13 = vector.broadcast %cst_8 : f32 to vector<16x32xf32>
    %14 = arith.addf %13, %12 : vector<16x32xf32>
    %cst_9 = arith.constant 1.000000e+00 : f32
    %15 = vector.broadcast %cst_9 : f32 to vector<16x32xf32>
    %16 = arith.divf %15, %14 : vector<16x32xf32>
    %cst_10 = arith.constant 1.06140542 : f32
    %17 = vector.broadcast %cst_10 : f32 to vector<16x32xf32>
    %18 = arith.mulf %17, %16 : vector<16x32xf32>
    %cst_11 = arith.constant -1.45315206 : f32
    %19 = vector.broadcast %cst_11 : f32 to vector<16x32xf32>
    %20 = arith.addf %18, %19 : vector<16x32xf32>
    %21 = arith.mulf %20, %16 : vector<16x32xf32>
    %cst_12 = arith.constant 1.42141378 : f32
    %22 = vector.broadcast %cst_12 : f32 to vector<16x32xf32>
    %23 = arith.addf %21, %22 : vector<16x32xf32>
    %24 = arith.mulf %23, %16 : vector<16x32xf32>
    %cst_13 = arith.constant -0.284496725 : f32
    %25 = vector.broadcast %cst_13 : f32 to vector<16x32xf32>
    %26 = arith.addf %24, %25 : vector<16x32xf32>
    %27 = arith.mulf %26, %16 : vector<16x32xf32>
    %cst_14 = arith.constant 0.254829586 : f32
    %28 = vector.broadcast %cst_14 : f32 to vector<16x32xf32>
    %29 = arith.addf %27, %28 : vector<16x32xf32>
    %30 = arith.mulf %29, %16 : vector<16x32xf32>
    %cst_15 = arith.constant 0.000000e+00 : f32
    %31 = vector.broadcast %cst_15 : f32 to vector<16x32xf32>
    %32 = arith.subf %31, %10 : vector<16x32xf32>
    %33 = arith.mulf %32, %10 : vector<16x32xf32>
    %34 = math.exp %33 : vector<16x32xf32>
    %35 = arith.mulf %30, %34 : vector<16x32xf32>
    %cst_16 = arith.constant 1.000000e+00 : f32
    %36 = vector.broadcast %cst_16 : f32 to vector<16x32xf32>
    %37 = arith.subf %36, %35 : vector<16x32xf32>
    %cst_17 = arith.constant 0.000000e+00 : f32
    %38 = vector.broadcast %cst_17 : f32 to vector<16x32xf32>
    %39 = arith.cmpf olt, %9, %38 : vector<16x32xf32>
    %cst_18 = arith.constant 0.000000e+00 : f32
    %40 = vector.broadcast %cst_18 : f32 to vector<16x32xf32>
    %41 = arith.subf %40, %37 : vector<16x32xf32>
    %42 = arith.select %39, %41, %37 : vector<16x32xi1>, vector<16x32xf32>
    %cst_19 = arith.constant 1.000000e+00 : f32
    %43 = vector.broadcast %cst_19 : f32 to vector<16x32xf32>
    %44 = arith.addf %43, %42 : vector<16x32xf32>
    %45 = arith.mulf %7, %44 : vector<16x32xf32>
    %c0_20 = arith.constant 0 : index
    %c0_21 = arith.constant 0 : index
    %46 = vector.load %arg4[%c0_20, %c0_21] : memref<32x16xf32, #tpu.memory_space<vmem>>, vector<32x16xf32>
    %cst_22 = arith.constant dense<0.000000e+00> : vector<16x16xf32>
    %47 = tpu.matmul %45, %46, %cst_22 {dimension_numbers = #tpu.dot_dimension_numbers<[1], [0], [0], [1], [0, 0, 1, 1], [], []>} : vector<16x32xf32>, vector<32x16xf32>, vector<16x16xf32> -> vector<16x16xf32>
    %c0_23 = arith.constant 0 : index
    %c0_24 = arith.constant 0 : index
    %48 = vector.load %arg5[%c0_23, %c0_24] : memref<1x16xf32, #tpu.memory_space<vmem>>, vector<1x16xf32>
    %49 = vector.broadcast %48 : vector<1x16xf32> to vector<16x16xf32>
    %50 = arith.addf %47, %49 : vector<16x16xf32>
    %c0_25 = arith.constant 0 : index
    %c0_26 = arith.constant 0 : index
    %51 = vector.load %arg6[%c0_25, %c0_26] : memref<16x16xf32, #tpu.memory_space<vmem>>, vector<16x16xf32>
    tpu.vector_store %arg6[%c0_25, %c0_26], %50 {strides = array<i32>} : memref<16x16xf32, #tpu.memory_space<vmem>>, vector<16x16xf32>,
    return
  }
  func.func @transform_0(%arg0: i32) -> (i32, i32) {
    %c0_i32 = arith.constant 0 : i32
    %c0_i32_0 = arith.constant 0 : i32
    return %arg0, %c0_i32 : i32, i32
  }
  func.func @transform_1(%arg0: i32) -> (i32, i32) {
    %c0_i32 = arith.constant 0 : i32
    %c0_i32_0 = arith.constant 0 : i32
    %c0_i32_1 = arith.constant 0 : i32
    return %c0_i32, %c0_i32_0 : i32, i32
  }
  func.func @transform_2(%arg0: i32) -> (i32, i32) {
    %c0_i32 = arith.constant 0 : i32
    %c0_i32_0 = arith.constant 0 : i32
    %c0_i32_1 = arith.constant 0 : i32
    return %c0_i32, %c0_i32_0 : i32, i32
  }
  func.func @transform_3(%arg0: i32) -> (i32, i32) {
    %c0_i32 = arith.constant 0 : i32
    %c0_i32_0 = arith.constant 0 : i32
    %c0_i32_1 = arith.constant 0 : i32
    return %c0_i32, %c0_i32_0 : i32, i32
  }
  func.func @transform_4(%arg0: i32) -> (i32, i32) {
    %c0_i32 = arith.constant 0 : i32
    %c0_i32_0 = arith.constant 0 : i32
    %c0_i32_1 = arith.constant 0 : i32
    return %c0_i32, %c0_i32_0 : i32, i32
  }
  func.func @transform_5(%arg0: i32) -> (i32, i32) {
    %c0_i32 = arith.constant 0 : i32
    %c0_i32_0 = arith.constant 0 : i32
    return %arg0, %c0_i32 : i32, i32
  }
}

</mosaic_0001>

<bundles_post_ra>
// kernel: tpu_custom_call.1
= control target key start
LH: loop header
LB: loop body
LE: loop exit
PB: predicated region body
PF: predicated region fallthrough
CT: control target
= control target key end

     0   :  { %vm32_vm0 = vcmask 130048   ;;  %s439_s0 = inlined_call_operand.vmem [shape: f32[16,16], index: 0, kind: input, shape index: {}]   ;;  %s440_s1 = inlined_call_operand.vmem [shape: f32[16,32], index: 1, kind: input, shape index: {}]   ;;  %s441_s2 = inlined_call_operand.vmem [shape: f32[1,32], index: 2, kind: input, shape index: {}]   ;;  %s442_s3 = inlined_call_operand.vmem [shape: f32[32,16], index: 3, kind: input, shape index: {}]   ;;  %s443_s4 = inlined_call_operand.vmem [shape: f32[1,16], index: 4, kind: input, shape index: {}]   ;;  %s444_s5 = inlined_call_operand.hbm [shape: f32[16,16], index: 5, kind: output, shape index: {}]  }
   0x1   :  { %v23_v0 = vld [vmem:[%s440_s1] sm:$0xff]  ;;  %v24_v1 = vld [vmem:[%s440_s1 + $0x8] sm:$0xff] }
   0x2   :  { %v21_v2 = vld [vmem:[%s439_s0] sm:$0xff]  ;;  %v313_v3 = vpack.c.bf16 %v24_v1, %v23_v0 }
   0x3   :  { %299 = vmatprep.mubr.msk.f32.mxu0 %vm32_vm0, %v21_v2 }
   0x4   :  { %10 = vsyncpa [#allocation3], 0  ;;  %314 = vmatprep.subr.bf16.mxu0 %v313_v3  ;;  %v22_v4 = vld [vmem:[%s439_s0 + $0x8] sm:$0xff]  ;;  %v168_v5 = vld [vmem:[%s442_s3] sm:$0xff]  ;;  %vm179_vm3 = vcmask 261120   ;;  %s360_s9 = smov [#allocation2]  }
   0x5   :  { %316 = vmatpush3.bf16.msra.mxu0 %v313_v3  ;;  %v169_v6 = vld [vmem:[%s442_s3 + $0x8] sm:$0xff]  ;;  %v170_v8 = vld [vmem:[%s442_s3 + $0x10] sm:$0xff]  ;;  %v171_v9 = vld [vmem:[%s442_s3 + $0x18] sm:$0xff]  ;;  %s268_s10 = sshll.u32 %s360_s9, 4  ;;  %s269_s10 = int_to_ptr.vmem [resolvable:$true] %s268_s10 }
   0x6   :  { %v317_v7 = vpack.c.bf16 %v169_v6, %v168_v5  ;;  %v321_v10 = vpack.c.bf16 %v171_v9, %v170_v8  ;;  %v279_v11 = vld [vmem:[%s441_s2] ss:$0 sm:$0xff]  ;;  %s336_s11 = scalar_lea.vmem %s269_s10, 256  ;;  %p341_p1 = scmp.lt.s32.totalorder %s269_s10, %s269_s10 }
   0x7   :  { %v282_v2 = vld [vmem:[%s443_s4] ss:$0 sm:$0xff]  ;;  %p337_p0 = scmp.ne.s32.totalorder %s269_s10, %s336_s11  ;;  %p342_p2 = scmp.lt.s32.totalorder %s336_s11, %s336_s11 }
   0x8   :  { %300 = vmatmul.mubr.msk.f32.vlgmr.msra.gmra.mrb[0].mxu0 %vm32_vm0, %v22_v4  ;;  %318 = vmatprep.subr.bf16.mxu1 %v317_v7 }
   0x9   :  { %320 = vmatpush3.bf16.msra.mxu1 %v317_v7  ;;  %p343_p3 = por %p342_p2, %p341_p1 }
   0xa   :  { %322 = vmatprep.subr.bf16.mxu1 %v321_v10 }
   0xb   :  { %p344_p4 = pnand %p343_p3, %p337_p0 }
   0xd   :  { %324 = vmatpush3.bf16.msra.mxu1 %v321_v10 }
  0xdb   :  { %v301_v12 = vpop.f32.mrb[0].mxu0 }
  0xdc   :  { %v111_v13 = vadd.f32 %v301_v12, %v279_v11  ;;  %v105_v14 = vpop.f32.mrb[1].mxu0 }
  0xdd   :  { %v106_v15 = vadd.f32 %v279_v11, %v105_v14 }
  0xde   :  { %v117_v16 = vmul.f32 0.70710677, %v111_v13  ;;  %v115_v63 = vmul.f32 0.5, %v111_v13 }
  0xdf   :  { %v116_v17 = vmul.f32 0.70710677, %v106_v15  ;;  %v114_v61 = vmul.f32 0.5, %v106_v15 }
  0xe0   :  { %v119_v18 = vand.u32 2147483647, %v117_v16  ;;  %vm159_vm1 = vcmp.lt.f32.partialorder %v117_v16, 0.0 }
  0xe1   :  { %v118_v19 = vand.u32 2147483647, %v116_v17  ;;  %vm158_vm2 = vcmp.lt.f32.partialorder %v116_v17, 0.0 }
  0xe2   :  { %v121_v20 = vmul.f32 0.3275911, %v119_v18  ;;  %v147_v24 = vsub.f32 0.0, %v119_v18 }
  0xe3   :  { %v120_v21 = vmul.f32 0.3275911, %v118_v19  ;;  %v146_v25 = vsub.f32 0.0, %v118_v19 }
  0xe4   :  { %v123_v22 = vadd.f32 1.0, %v121_v20  ;;  %v149_v27 = vmul.f32 %v147_v24, %v119_v18 }
  0xe5   :  { %v122_v23 = vadd.f32 1.0, %v120_v21  ;;  %v148_v30 = vmul.f32 %v146_v25, %v118_v19 }
  0xe6   :  { %328 = vrcp.f32 %v123_v22  ;;  %v152_v33 = vmul.f32 1.442695, %v149_v27 }
  0xe7   :  { %330 = vrcp.f32 %v122_v23  ;;  %v150_v36 = vmul.f32 1.442695, %v148_v30 }
  0xe8   :  { %332 = vpow2.f32 %v152_v33 }
  0xe9   :  { %334 = vpow2.f32 %v150_v36 }
  0xf0   :  { %v329_v26 = vpop.eup %328 }
  0xf1   :  { %v331_v28 = vpop.eup %330  ;;  %v129_v29 = vmul.f32 1.0614054, %v329_v26 }
  0xf2   :  { %v128_v31 = vmul.f32 1.0614054, %v331_v28  ;;  %v333_v49 = vpop.eup %332 }
  0xf3   :  { %v131_v32 = vadd.f32 -1.4531521, %v129_v29  ;;  %v335_v51 = vpop.eup %334 }
  0xf4   :  { %v130_v34 = vadd.f32 -1.4531521, %v128_v31 }
  0xf5   :  { %v133_v35 = vmul.f32 %v329_v26, %v131_v32 }
  0xf6   :  { %v132_v37 = vmul.f32 %v331_v28, %v130_v34 }
  0xf7   :  { %v135_v38 = vadd.f32 1.4214138, %v133_v35 }
  0xf8   :  { %v134_v39 = vadd.f32 1.4214138, %v132_v37 }
  0xf9   :  { %v137_v40 = vmul.f32 %v329_v26, %v135_v38 }
  0xfa   :  { %v136_v41 = vmul.f32 %v331_v28, %v134_v39 }
  0xfb   :  { %v139_v42 = vadd.f32 -0.28449672, %v137_v40 }
  0xfc   :  { %v138_v43 = vadd.f32 -0.28449672, %v136_v41 }
  0xfd   :  { %v141_v44 = vmul.f32 %v329_v26, %v139_v42 }
  0xfe   :  { %v140_v45 = vmul.f32 %v331_v28, %v138_v43 }
  0xff   :  { %v143_v46 = vadd.f32 0.2548296, %v141_v44 }
 0x100   :  { %v142_v47 = vadd.f32 0.2548296, %v140_v45 }
 0x101   :  { %v145_v48 = vmul.f32 %v329_v26, %v143_v46 }
 0x102   :  { %v144_v50 = vmul.f32 %v331_v28, %v142_v47 }
 0x103   :  { %v155_v52 = vmul.f32 %v333_v49, %v145_v48 }
 0x104   :  { %v154_v53 = vmul.f32 %v335_v51, %v144_v50 }
 0x105   :  { %v157_v54 = vsub.f32 1.0, %v155_v52 }
 0x106   :  { %v156_v55 = vsub.f32 1.0, %v154_v53 }
 0x107   :  { %v161_v56 = vsub.f32 0.0, %v157_v54 }
 0x108   :  { %v160_v57 = vsub.f32 0.0, %v156_v55 }
 0x109   :  { %v163_v58 = vsel %vm159_vm1, %v161_v56, %v157_v54 }
 0x10a   :  { %v165_v59 = vadd.f32 1.0, %v163_v58  ;;  %v162_v60 = vsel %vm158_vm2, %v160_v57, %v156_v55 }
 0x10b   :  { %v164_v62 = vadd.f32 1.0, %v162_v60 }
 0x10c   :  { %v167_v1 = vmul.f32 %v165_v59, %v115_v63 }
 0x10d   :  { %v166_v0 = vmul.f32 %v164_v62, %v114_v61 }
 0x10f   :  { %310 = vmatprep.mubr.msk.f32.mxu1 %vm179_vm3, %v166_v0 }
 0x110   :  { %311 = vmatmul.mubr.msk.f32.vlgmr.msra.gmra.mrb[0].mxu1 %vm179_vm3, %v167_v1 }
 0x1e3   :  { %v312_v3 = vpop.f32.mrb[0].mxu1 }
 0x1e4   :  { %v258_v4 = vadd.f32 %v312_v3, %v282_v2  ;;  %v252_v5 = vpop.f32.mrb[1].mxu1 }
 0x1e5   :  { %v253_v6 = vadd.f32 %v282_v2, %v252_v5 }
 0x1e6   :  { %262 = vst.msk [vmem:[#allocation2 + $0x8] sm:$0xff] %vm32_vm0, %v258_v4 }
 0x1e7   :  { %261 = vst.msk [vmem:[#allocation2] sm:$0xff] %vm32_vm0, %v253_v6 }
 0x1e8   :  { %347 = shalt.err (!%p344_p4)
}
 0x1e9   :  { %s348_s13 = scalar_lea.hbm %s444_s5, 256 }
 0x1ea   :  { %p349_p5 = scmp.ne.s32.totalorder %s444_s5, %s348_s13  ;;  %p352_p6 = scmp.lt.u32.totalorder %s348_s13, %s444_s5 }
 0x1ec   :  { %p354_p7 = pnand %p352_p6, %p349_p5 }
 0x1ee   :  { %357 = shalt.err (!%p354_p7)
}
 0x1ef   :  { %s361_s18 = smov 128   ;;  %s362_s19 = smov 8  }
 0x1f0   :  { %274 = dma.vmem_to_hbm [thread:$0]  %s269_s10, 256, %s444_s5, [#allocation3], %s361_s18, %s361_s18, %s362_s19  }
 0x1f1   :  { %358 = dma.done.wait [#allocation3], 256  }
 0x1f2   :  { %359 = vsyncadd [#allocation3], 4294967040 }
 0x1f3   :  { %278 = vsyncpa [#allocation3], 1 }

</bundles_post_ra>
